<compile_context>
chip_gen: v6e
topology: v6e:2x2x1
jax: 0.10.0
libtpu: 0.0.40
codegen_flags: <defaults>
</compile_context>

<pallas_src>
import jax
import jax.numpy as jnp
from jax.experimental import pallas as pl
from jax.experimental.pallas import tpu as pltpu


def make_encoding(max_length: int, token_size: int) -> jnp.ndarray:
    """Equivalent of the buffer built in PositionalEncoder.__init__ (float32)."""
    pos = jnp.arange(max_length, dtype=jnp.float32).reshape(-1, 1)
    div = jnp.power(
        10000.0,
        jnp.arange(0, token_size, 2, dtype=jnp.float32) / float(token_size),
    ).reshape(1, -1)
    tmp = pos / div  # (max_length, token_size // 2)
    enc = jnp.zeros((1, max_length, token_size), jnp.float32)
    enc = enc.at[:, :, 0::2].set(jnp.sin(tmp))
    enc = enc.at[:, :, 1::2].set(jnp.cos(tmp))
    return enc


def _add_enc_kernel(x_ref, enc_ref, o_ref):
    # x_ref: (TB, S*T); enc_ref: (1, S*T) broadcast along the sublane (row) dim.
    o_ref[...] = (x_ref[...] + enc_ref[...]).astype(o_ref.dtype)


def _add_enc_dropout_kernel(x_ref, enc_ref, mask_ref, o_ref):
    # mask_ref already carries the 1/(1-p) inverted-dropout scaling (0 = dropped).
    o_ref[...] = ((x_ref[...] + enc_ref[...]) * mask_ref[...]).astype(o_ref.dtype)


def _choose_row_tile(n_rows: int, bytes_per_row: int,
                     target_bytes: int = 2 * 1024 * 1024) -> int:
    """Largest divisor of n_rows whose tile stays <= target_bytes.

    Prefers multiples of 8 (f32 sublane granularity) when the full dim does
    not fit.
    """
    cap = max(1, min(n_rows, target_bytes // max(bytes_per_row, 1)))
    if cap >= n_rows:
        return n_rows
    # Prefer a sublane-aligned divisor, then fall back to any divisor.
    for d in range(cap, 0, -1):
        if n_rows % d == 0 and d % 8 == 0:
            return d
    for d in range(cap, 0, -1):
        if n_rows % d == 0:
            return d
    return 1


def positional_encoder_forward(x: jnp.ndarray,
                               encoding: jnp.ndarray,
                               *,
                               p: float = 0.1,
                               training: bool = False,
                               seed: int = 0) -> jnp.ndarray:
    """x: (B, S, T); encoding: (1, maxLength, T) float32."""
    B, S, T = x.shape
    # forward slices encoding by batch size (X.shape[0]); broadcasting against
    # (B, S, T) requires S == B (same constraint as the PyTorch module).
    assert S == B, "PyTorch module's broadcast only works when seq == batch"

    N = S * T
    x2 = x.reshape(B, N)                                     # lane-dense 2D view
    enc2 = encoding[0, :B, :].reshape(1, N).astype(jnp.float32)

    tb = _choose_row_tile(B, N * x2.dtype.itemsize)
    grid = (B // tb,)
    # TODO(synk): for extreme S*T (a single row > a few MiB) add a second grid
    # axis over the lane dimension; not needed at these and typical sizes.

    row_spec = pl.BlockSpec((tb, N), lambda i: (i, 0))
    enc_spec = pl.BlockSpec((1, N), lambda i: (0, 0))        # resident block
    cparams = pltpu.CompilerParams(dimension_semantics=("parallel",))

    if training and p > 0.0:
        if p >= 1.0:
            mask = jnp.zeros((B, N), jnp.float32)            # everything dropped
        else:
            keep = jax.random.bernoulli(jax.random.PRNGKey(seed), 1.0 - p, (B, N))
            mask = keep.astype(jnp.float32) * (1.0 / (1.0 - p))
        out2 = pl.pallas_call(
            _add_enc_dropout_kernel,
            out_shape=jax.ShapeDtypeStruct((B, N), x.dtype),
            grid=grid,
            in_specs=[row_spec, enc_spec, row_spec],
            out_specs=row_spec,
            compiler_params=cparams,
        )(x2, enc2, mask)
    else:
        out2 = pl.pallas_call(
            _add_enc_kernel,
            out_shape=jax.ShapeDtypeStruct((B, N), x.dtype),
            grid=grid,
            in_specs=[row_spec, enc_spec],
            out_specs=row_spec,
            compiler_params=cparams,
        )(x2, enc2)

    return out2.reshape(B, S, T)


if __name__ == "__main__":
    # Small shapes consistent with the module: batch == seq (see note above).
    B, S, T = 8, 8, 32
    MAX_LEN = 16

    key = jax.random.PRNGKey(0)
    x = jax.random.normal(key, (B, S, T), dtype=jnp.float32)

    encoding = make_encoding(MAX_LEN, T)

    # Eval mode (dropout is identity) -- deterministic, checked against reference.
    out_eval = positional_encoder_forward(x, encoding, p=0.1, training=False)
    out_eval = jax.block_until_ready(out_eval)

    ref = x + encoding[:, :B, :]  # same broadcasting as the PyTorch forward
    assert out_eval.shape == (B, S, T)
    assert jnp.allclose(out_eval, ref, atol=1e-6, rtol=1e-6), "eval-mode mismatch"

    # Train mode (dropout active) -- every element is either 0 or ref/(1-p).
    out_train = positional_encoder_forward(x, encoding, p=0.1, training=True, seed=123)
    out_train = jax.block_until_ready(out_train)
    assert out_train.shape == (B, S, T)
    scaled = ref * (1.0 / (1.0 - 0.1))
    ok = jnp.isclose(out_train, 0.0, atol=1e-6) | jnp.isclose(
        out_train, scaled, atol=1e-5, rtol=1e-5)
    assert bool(jnp.all(ok)), "train-mode values not in {0, (x+enc)/(1-p)}"

    print("KERNEL_OK")
</pallas_src>

<mosaic_0001>
module attributes {stable_mosaic.version = 11 : i64} {
  func.func @_add_enc_kernel(%arg0: i32, %arg1: memref<8x256xf32, #tpu.memory_space<vmem>>, %arg2: memref<1x256xf32, #tpu.memory_space<vmem>>, %arg3: memref<8x256xf32, #tpu.memory_space<vmem>>) attributes {dimension_semantics = [#tpu.dimension_semantics<parallel>], iteration_bounds = array<i64: 1>, scalar_prefetch = 0 : i64, scratch_operands = 0 : i64, tpu.core_type = #tpu.core_type<tc>, window_params = [{transform_indices = @transform_0, window_bounds = array<i64: 8, 256>}, {pipeline_mode = #tpu.pipeline_mode<synchronous>, transform_indices = @transform_1, window_bounds = array<i64: 1, 256>}, {transform_indices = @transform_2, window_bounds = array<i64: 8, 256>}]} {
    %c0 = arith.constant 0 : index
    %c0_0 = arith.constant 0 : index
    %0 = vector.load %arg1[%c0, %c0_0] : memref<8x256xf32, #tpu.memory_space<vmem>>, vector<8x256xf32>
    %c0_1 = arith.constant 0 : index
    %c0_2 = arith.constant 0 : index
    %1 = vector.load %arg2[%c0_1, %c0_2] : memref<1x256xf32, #tpu.memory_space<vmem>>, vector<1x256xf32>
    %2 = vector.broadcast %1 : vector<1x256xf32> to vector<8x256xf32>
    %3 = arith.addf %0, %2 : vector<8x256xf32>
    %c0_3 = arith.constant 0 : index
    %c0_4 = arith.constant 0 : index
    %4 = vector.load %arg3[%c0_3, %c0_4] : memref<8x256xf32, #tpu.memory_space<vmem>>, vector<8x256xf32>
    tpu.vector_store %arg3[%c0_3, %c0_4], %3 {strides = array<i32>} : memref<8x256xf32, #tpu.memory_space<vmem>>, vector<8x256xf32>,
    return
  }
  func.func @transform_0(%arg0: i32) -> (i32, i32) {
    %c0_i32 = arith.constant 0 : i32
    %c0_i32_0 = arith.constant 0 : i32
    return %arg0, %c0_i32 : i32, i32
  }
  func.func @transform_1(%arg0: i32) -> (i32, i32) {
    %c0_i32 = arith.constant 0 : i32
    %c0_i32_0 = arith.constant 0 : i32
    %c0_i32_1 = arith.constant 0 : i32
    return %c0_i32, %c0_i32_0 : i32, i32
  }
  func.func @transform_2(%arg0: i32) -> (i32, i32) {
    %c0_i32 = arith.constant 0 : i32
    %c0_i32_0 = arith.constant 0 : i32
    return %arg0, %c0_i32 : i32, i32
  }
}

</mosaic_0001>

<bundles_post_ra>
// kernel: tpu_custom_call.1
= control target key start
LH: loop header
LB: loop body
LE: loop exit
PB: predicated region body
PF: predicated region fallthrough
CT: control target
= control target key end

     0   :  { %7 = vsyncpa [#allocation3], 0  ;;  %s166_s0 = inlined_call_operand.hbm [shape: f32[8,256], index: 0, kind: input, shape index: {}]   ;;  %s167_s1 = inlined_call_operand.hbm [shape: f32[1,256], index: 1, kind: input, shape index: {}]   ;;  %s168_s2 = inlined_call_operand.hbm [shape: f32[8,256], index: 2, kind: output, shape index: {}]  }
   0x1   :  { %8 = vsyncpa [#allocation6], 0 }
   0x2   :  { %9 = vsyncpa [#allocation4], 0  ;;  %s139_s9 = smov [#allocation2]   ;;  %s140_s11 = smov [#allocation5]  }
   0x3   :  { %s16_s10 = sshll.u32 %s139_s9, 4  ;;  %s26_s12 = sshll.u32 %s140_s11, 4  ;;  %s17_s10 = int_to_ptr.vmem [resolvable:$true] %s16_s10  ;;  %s27_s12 = int_to_ptr.vmem [resolvable:$true] %s26_s12 }
   0x4   :  { %s81_s13 = scalar_lea.vmem %s17_s10, 256  ;;  %p86_p1 = scmp.lt.s32.totalorder %s17_s10, %s17_s10 }
   0x5   :  { %p82_p0 = scmp.ne.s32.totalorder %s17_s10, %s81_s13  ;;  %p87_p2 = scmp.lt.s32.totalorder %s81_s13, %s81_s13 }
   0x7   :  { %p88_p3 = por %p87_p2, %p86_p1 }
   0x9   :  { %p89_p4 = pnand %p88_p3, %p82_p0 }
   0xb   :  { %92 = shalt.err (!%p89_p4)
}
   0xc   :  { %19 = dma.hbm_to_vmem [thread:$0]  %s166_s0, 256, %s17_s10, [#allocation3]  }
   0xd   :  { %s101_s16 = scalar_lea.vmem %s27_s12, 32  ;;  %p106_p6 = scmp.lt.s32.totalorder %s27_s12, %s27_s12 }
   0xe   :  { %p102_p5 = scmp.ne.s32.totalorder %s27_s12, %s101_s16  ;;  %p107_p7 = scmp.lt.s32.totalorder %s101_s16, %s101_s16 }
  0x10   :  { %p108_p8 = por %p107_p7, %p106_p6 }
  0x12   :  { %p109_p9 = pnand %p108_p8, %p102_p5 }
  0x14   :  { %112 = shalt.err (!%p109_p9)
}
  0x15   :  { %29 = dma.hbm_to_vmem [thread:$0]  %s167_s1, 32, %s27_s12, [#allocation6]  }
  0x16   :  { %133 = dma.done.wait [#allocation3], 256  }
  0x17   :  { %134 = vsyncadd [#allocation3], 4294967040 }
  0x18   :  { %135 = dma.done.wait [#allocation6], 32  }
  0x19   :  { %136 = vsyncadd [#allocation6], 4294967264  ;;  %v40_v0 = vlaneseq  ;;  %v36_v4 = vld [vmem:[#allocation2] sm:$0xff]  ;;  %v38_v5 = vld [vmem:[#allocation5] sm:$0x3]  ;;  %s141_s0 = smov [#allocation7]  }
  0x1a   :  { %v37_v6 = vld [vmem:[#allocation2 + $0x8] sm:$0xff]  ;;  %s60_s19 = sshll.u32 %s141_s0, 4  ;;  %s61_s19 = int_to_ptr.vmem [resolvable:$true] %s60_s19 }
  0x1b   :  { %v41_v1 = vshrl.u32 %v40_v0, 7  ;;  %s113_s1 = scalar_lea.vmem %s61_s19, 256  ;;  %p118_p11 = scmp.lt.s32.totalorder %s61_s19, %s61_s19 }
  0x1c   :  { %p114_p10 = scmp.ne.s32.totalorder %s61_s19, %s113_s1  ;;  %p119_p12 = scmp.lt.s32.totalorder %s113_s1, %s113_s1 }
  0x1d   :  { %v42_v2 = vsub.s32 0, %v41_v1  ;;  %v46_v3 = vsub.s32 1, %v41_v1 }
  0x1e   :  { %p120_p13 = por %p119_p12, %p118_p11 }
  0x1f   :  { %v43_v7 = vrot.slane %v38_v5, %v42_v2  ;;  %v47_v8 = vrot.slane %v38_v5, %v46_v3 }
  0x20   :  { %p121_p0 = pnand %p120_p13, %p114_p10 }
  0x21   :  { %v50_v9 = vadd.f32 %v43_v7, %v36_v4  ;;  %v51_v10 = vadd.f32 %v47_v8, %v37_v6 }
  0x23   :  { %52 = vst [vmem:[#allocation7] sm:$0xff] %v50_v9  ;;  %53 = vst [vmem:[#allocation7 + $0x8] sm:$0xff] %v51_v10 }
  0x24   :  { %124 = shalt.err (!%p121_p0)
}
  0x25   :  { %63 = dma.vmem_to_hbm [thread:$0]  %s61_s19, 256, %s168_s2, [#allocation4]  }
  0x26   :  { %137 = dma.done.wait [#allocation4], 256  }
  0x27   :  { %138 = vsyncadd [#allocation4], 4294967040 }
  0x28   :  { %67 = vsyncpa [#allocation3], 1 }
  0x29   :  { %68 = vsyncpa [#allocation6], 1 }
  0x2a   :  { %69 = vsyncpa [#allocation4], 1 }

</bundles_post_ra>
